<compile_context>
chip_gen: v7x
topology: tpu7x:2x2x1
jax: 0.10.0
libtpu: 0.0.40
codegen_flags: <defaults>
</compile_context>

<pallas_src>
import jax
import jax.numpy as jnp
from jax.experimental import pallas as pl
from jax.experimental.pallas import tpu as pltpu

_EPS = 1e-6  # matches nn.LayerNorm(layer.size, eps=1e-06)


# ----------------------------------------------------------------------------
# Kernels
# ----------------------------------------------------------------------------
def _prenorm_residual_linear_kernel(x_ref, gamma_ref, beta_ref, w_ref, b_ref,
                                    o_ref):
    """One encoder layer tile: o = x + Linear(LayerNorm(x)). Dropout = identity."""
    x = x_ref[...].astype(jnp.float32)                 # (TILE_R, D); no-op for f32 in
    d = x.shape[-1]
    inv_d = 1.0 / d

    # Fused single-pass LayerNorm statistics: var = E[x^2] - mean^2.
    s1 = jnp.sum(x, axis=-1, keepdims=True)
    s2 = jnp.sum(x * x, axis=-1, keepdims=True)
    mean = s1 * inv_d
    var = s2 * inv_d - mean * mean
    inv = jax.lax.rsqrt(var + _EPS)
    normed = (x - mean) * inv * gamma_ref[...] + beta_ref[...]

    # Sublayer: Linear(size, size) on the MXU, bf16 inputs / f32 accumulation.
    y = jnp.dot(normed.astype(jnp.bfloat16), w_ref[...],
                preferred_element_type=jnp.float32)
    y = y + b_ref[...]

    # Residual connection (dropout in eval mode is the identity).
    # For bf16 inputs one could re-read x_ref here instead of keeping the f32
    # copy live across the matmul; for f32 inputs `x` is the loaded tile itself.
    o_ref[...] = (x + y).astype(o_ref.dtype)


def _layernorm_kernel(x_ref, gamma_ref, beta_ref, o_ref):
    """Final Encoder LayerNorm (eps = 1e-6)."""
    x = x_ref[...].astype(jnp.float32)
    d = x.shape[-1]
    inv_d = 1.0 / d
    s1 = jnp.sum(x, axis=-1, keepdims=True)
    s2 = jnp.sum(x * x, axis=-1, keepdims=True)
    mean = s1 * inv_d
    var = s2 * inv_d - mean * mean
    inv = jax.lax.rsqrt(var + _EPS)
    o_ref[...] = ((x - mean) * inv * gamma_ref[...] + beta_ref[...]).astype(
        o_ref.dtype)


# ----------------------------------------------------------------------------
# Tiling / VMEM budgeting
# ----------------------------------------------------------------------------
def _pick_tile_r(R):
    # Largest row tile that keeps MXU M-occupancy high without blowing VMEM.
    # Must be a multiple of 8 (f32 sublane) OR equal to the full row extent.
    if R <= 512:
        return R          # single/full block is always layout-legal
    return 512            # multiple of 8 and of 256 (v6e/v7x MXU M-dim)


def _vmem_limit_bytes(tile_r, D):
    # resident bf16 W + LN/bias params + double-buffered f32 in/out row tiles,
    # with 4x headroom for the f32 working set and compiler scratch; clamped to
    # 64 MiB so the same setting is valid on v7x's smaller VMEM.
    tile_bytes = tile_r * D * 4
    need = D * D * 2 + 4 * D * 4 + 2 * 2 * tile_bytes
    return int(min(max(4 * need, 16 << 20), 64 << 20))


# ----------------------------------------------------------------------------
# Wrappers
# ----------------------------------------------------------------------------
def _encoder_layer(x2, gamma, beta, w_bf16, b, tile_r, vmem_bytes):
    R, D = x2.shape
    grid = (pl.cdiv(R, tile_r),)
    return pl.pallas_call(
        _prenorm_residual_linear_kernel,
        out_shape=jax.ShapeDtypeStruct((R, D), x2.dtype),
        grid_spec=pltpu.PrefetchScalarGridSpec(
            num_scalar_prefetch=0,
            grid=grid,
            in_specs=[
                # x: row-tiled -> double-buffered DMA pipeline.
                # TODO(synk): sweep pipeline_mode=pl.Buffered(3) if DMA is exposed.
                pl.BlockSpec((tile_r, D), lambda i: (i, 0)),
                pl.BlockSpec((1, D), lambda i: (0, 0)),   # gamma (resident)
                pl.BlockSpec((1, D), lambda i: (0, 0)),   # beta  (resident)
                pl.BlockSpec((D, D), lambda i: (0, 0)),   # W bf16 (resident)
                pl.BlockSpec((1, D), lambda i: (0, 0)),   # bias  (resident)
            ],
            out_specs=pl.BlockSpec((tile_r, D), lambda i: (i, 0)),
        ),
        compiler_params=pltpu.CompilerParams(
            dimension_semantics=("parallel",),   # shard row tiles across TCs (v7x)
            vmem_limit_bytes=vmem_bytes,
        ),
    )(x2, gamma.reshape(1, D), beta.reshape(1, D), w_bf16, b.reshape(1, D))


def _final_layernorm(x2, gamma, beta, tile_r, vmem_bytes):
    R, D = x2.shape
    grid = (pl.cdiv(R, tile_r),)
    return pl.pallas_call(
        _layernorm_kernel,
        out_shape=jax.ShapeDtypeStruct((R, D), x2.dtype),
        grid_spec=pltpu.PrefetchScalarGridSpec(
            num_scalar_prefetch=0,
            grid=grid,
            in_specs=[
                pl.BlockSpec((tile_r, D), lambda i: (i, 0)),
                pl.BlockSpec((1, D), lambda i: (0, 0)),
                pl.BlockSpec((1, D), lambda i: (0, 0)),
            ],
            out_specs=pl.BlockSpec((tile_r, D), lambda i: (i, 0)),
        ),
        compiler_params=pltpu.CompilerParams(
            dimension_semantics=("parallel",),
            vmem_limit_bytes=vmem_bytes,
        ),
    )(x2, gamma.reshape(1, D), beta.reshape(1, D))


def encoder_forward(x, mask, layer_params, final_gamma, final_beta):
    """Encoder.forward: x [B,S,D], mask unused by the Linear stand-in layer.

    layer_params: list of (gamma, beta, W, b) per cloned layer.
    """
    del mask  # no effect on the deterministic Linear stand-in sublayer
    B, S, D = x.shape
    R = B * S
    tile_r = _pick_tile_r(R)
    vmem_bytes = _vmem_limit_bytes(tile_r, D)

    x2 = x.reshape(R, D)
    for (gamma, beta, w, b) in layer_params:
        x2 = _encoder_layer(x2, gamma, beta, w.astype(jnp.bfloat16), b,
                            tile_r, vmem_bytes)
    out = _final_layernorm(x2, final_gamma, final_beta, tile_r, vmem_bytes)
    return out.reshape(B, S, D)


# ----------------------------------------------------------------------------
# Pure-JAX reference (same dtype placement: bf16 matmul inputs, f32 accum)
# ----------------------------------------------------------------------------
def _reference(x, layer_params, final_gamma, final_beta):
    def ln(v, g, bta):
        mean = jnp.mean(v, axis=-1, keepdims=True)
        var = jnp.mean(v * v, axis=-1, keepdims=True) - mean * mean
        return (v - mean) * jax.lax.rsqrt(var + _EPS) * g + bta

    for (gamma, beta, w, b) in layer_params:
        normed = ln(x, gamma, beta)
        y = jnp.dot(normed.astype(jnp.bfloat16), w.astype(jnp.bfloat16),
                    preferred_element_type=jnp.float32) + b
        x = x + y
    return ln(x, final_gamma, final_beta)


# ----------------------------------------------------------------------------
if __name__ == "__main__":
    key = jax.random.PRNGKey(0)
    B, S, D, N = 2, 8, 32, 2      # small test shapes; D=32 underfills lanes/MXU
    kx, *lkeys = jax.random.split(key, 1 + 2 * N)

    x = jax.random.normal(kx, (B, S, D), dtype=jnp.float32)
    mask = jnp.ones((B, 1, S), dtype=jnp.float32)   # unused by Linear stand-in

    # Deterministic synthetic parameters (clones() would deepcopy one layer;
    # distinct params per layer make the stacked test more meaningful).
    layer_params = []
    for n in range(N):
        kw, kb = lkeys[2 * n], lkeys[2 * n + 1]
        gamma = jnp.ones((D,), dtype=jnp.float32)    # nn.LayerNorm weight init
        beta = jnp.zeros((D,), dtype=jnp.float32)    # nn.LayerNorm bias init
        w = jax.random.normal(kw, (D, D), dtype=jnp.float32) * 0.02
        b = jax.random.normal(kb, (D,), dtype=jnp.float32) * 0.02
        layer_params.append((gamma, beta, w, b))
    final_gamma = jnp.ones((D,), dtype=jnp.float32)
    final_beta = jnp.zeros((D,), dtype=jnp.float32)

    out = encoder_forward(x, mask, layer_params, final_gamma, final_beta)
    jax.block_until_ready(out)

    ref = _reference(x, layer_params, final_gamma, final_beta)
    assert out.shape == ref.shape
    err = float(jnp.max(jnp.abs(out - ref)))
    assert jnp.allclose(out, ref, atol=5e-3, rtol=5e-3), f"mismatch, max |err|={err}"

    print("KERNEL_OK")
</pallas_src>

<mosaic_0001>
module attributes {stable_mosaic.version = 11 : i64} {
  func.func @_prenorm_residual_linear_kernel(%arg0: i32, %arg1: memref<16x32xf32, #tpu.memory_space<vmem>>, %arg2: memref<1x32xf32, #tpu.memory_space<vmem>>, %arg3: memref<1x32xf32, #tpu.memory_space<vmem>>, %arg4: memref<32x32xbf16, #tpu.memory_space<vmem>>, %arg5: memref<1x32xf32, #tpu.memory_space<vmem>>, %arg6: memref<16x32xf32, #tpu.memory_space<vmem>>) attributes {dimension_semantics = [#tpu.dimension_semantics<parallel>], iteration_bounds = array<i64: 1>, scalar_prefetch = 0 : i64, scratch_operands = 0 : i64, tpu.core_type = #tpu.core_type<tc>, window_params = [{transform_indices = @transform_0, window_bounds = array<i64: 16, 32>}, {pipeline_mode = #tpu.pipeline_mode<synchronous>, transform_indices = @transform_1, window_bounds = array<i64: 1, 32>}, {pipeline_mode = #tpu.pipeline_mode<synchronous>, transform_indices = @transform_2, window_bounds = array<i64: 1, 32>}, {pipeline_mode = #tpu.pipeline_mode<synchronous>, transform_indices = @transform_3, window_bounds = array<i64: 32, 32>}, {pipeline_mode = #tpu.pipeline_mode<synchronous>, transform_indices = @transform_4, window_bounds = array<i64: 1, 32>}, {transform_indices = @transform_5, window_bounds = array<i64: 16, 32>}]} {
    %c0 = arith.constant 0 : index
    %c0_0 = arith.constant 0 : index
    %0 = vector.load %arg1[%c0, %c0_0] : memref<16x32xf32, #tpu.memory_space<vmem>>, vector<16x32xf32>
    %cst = arith.constant dense<0.000000e+00> : vector<16xf32>
    %1 = vector.multi_reduction <add>, %0, %cst [1] : vector<16x32xf32> to vector<16xf32>
    %2 = vector.shape_cast %1 : vector<16xf32> to vector<16x1xf32>
    %3 = arith.mulf %0, %0 : vector<16x32xf32>
    %cst_1 = arith.constant dense<0.000000e+00> : vector<16xf32>
    %4 = vector.multi_reduction <add>, %3, %cst_1 [1] : vector<16x32xf32> to vector<16xf32>
    %5 = vector.shape_cast %4 : vector<16xf32> to vector<16x1xf32>
    %cst_2 = arith.constant 3.125000e-02 : f32
    %6 = vector.broadcast %cst_2 : f32 to vector<16x1xf32>
    %7 = arith.mulf %2, %6 : vector<16x1xf32>
    %cst_3 = arith.constant 3.125000e-02 : f32
    %8 = vector.broadcast %cst_3 : f32 to vector<16x1xf32>
    %9 = arith.mulf %5, %8 : vector<16x1xf32>
    %10 = arith.mulf %7, %7 : vector<16x1xf32>
    %11 = arith.subf %9, %10 : vector<16x1xf32>
    %cst_4 = arith.constant 9.99999997E-7 : f32
    %12 = vector.broadcast %cst_4 : f32 to vector<16x1xf32>
    %13 = arith.addf %11, %12 : vector<16x1xf32>
    %14 = math.rsqrt %13 : vector<16x1xf32>
    %15 = vector.broadcast %7 : vector<16x1xf32> to vector<16x32xf32>
    %16 = arith.subf %0, %15 : vector<16x32xf32>
    %17 = vector.broadcast %14 : vector<16x1xf32> to vector<16x32xf32>
    %18 = arith.mulf %16, %17 : vector<16x32xf32>
    %c0_5 = arith.constant 0 : index
    %c0_6 = arith.constant 0 : index
    %19 = vector.load %arg2[%c0_5, %c0_6] : memref<1x32xf32, #tpu.memory_space<vmem>>, vector<1x32xf32>
    %20 = vector.broadcast %19 : vector<1x32xf32> to vector<16x32xf32>
    %21 = arith.mulf %18, %20 : vector<16x32xf32>
    %c0_7 = arith.constant 0 : index
    %c0_8 = arith.constant 0 : index
    %22 = vector.load %arg3[%c0_7, %c0_8] : memref<1x32xf32, #tpu.memory_space<vmem>>, vector<1x32xf32>
    %23 = vector.broadcast %22 : vector<1x32xf32> to vector<16x32xf32>
    %24 = arith.addf %21, %23 : vector<16x32xf32>
    %25 = arith.truncf %24 : vector<16x32xf32> to vector<16x32xbf16>
    %c0_9 = arith.constant 0 : index
    %c0_10 = arith.constant 0 : index
    %26 = vector.load %arg4[%c0_9, %c0_10] : memref<32x32xbf16, #tpu.memory_space<vmem>>, vector<32x32xbf16>
    %cst_11 = arith.constant dense<0.000000e+00> : vector<16x32xf32>
    %27 = tpu.matmul %25, %26, %cst_11 {dimension_numbers = #tpu.dot_dimension_numbers<[1], [0], [0], [1], [0, 0, 1, 1], [], []>} : vector<16x32xbf16>, vector<32x32xbf16>, vector<16x32xf32> -> vector<16x32xf32>
    %c0_12 = arith.constant 0 : index
    %c0_13 = arith.constant 0 : index
    %28 = vector.load %arg5[%c0_12, %c0_13] : memref<1x32xf32, #tpu.memory_space<vmem>>, vector<1x32xf32>
    %29 = vector.broadcast %28 : vector<1x32xf32> to vector<16x32xf32>
    %30 = arith.addf %27, %29 : vector<16x32xf32>
    %31 = arith.addf %0, %30 : vector<16x32xf32>
    %c0_14 = arith.constant 0 : index
    %c0_15 = arith.constant 0 : index
    %32 = vector.load %arg6[%c0_14, %c0_15] : memref<16x32xf32, #tpu.memory_space<vmem>>, vector<16x32xf32>
    tpu.vector_store %arg6[%c0_14, %c0_15], %31 {strides = array<i32>} : memref<16x32xf32, #tpu.memory_space<vmem>>, vector<16x32xf32>,
    return
  }
  func.func @transform_0(%arg0: i32) -> (i32, i32) {
    %c0_i32 = arith.constant 0 : i32
    %c0_i32_0 = arith.constant 0 : i32
    return %arg0, %c0_i32 : i32, i32
  }
  func.func @transform_1(%arg0: i32) -> (i32, i32) {
    %c0_i32 = arith.constant 0 : i32
    %c0_i32_0 = arith.constant 0 : i32
    %c0_i32_1 = arith.constant 0 : i32
    return %c0_i32, %c0_i32_0 : i32, i32
  }
  func.func @transform_2(%arg0: i32) -> (i32, i32) {
    %c0_i32 = arith.constant 0 : i32
    %c0_i32_0 = arith.constant 0 : i32
    %c0_i32_1 = arith.constant 0 : i32
    return %c0_i32, %c0_i32_0 : i32, i32
  }
  func.func @transform_3(%arg0: i32) -> (i32, i32) {
    %c0_i32 = arith.constant 0 : i32
    %c0_i32_0 = arith.constant 0 : i32
    %c0_i32_1 = arith.constant 0 : i32
    return %c0_i32, %c0_i32_0 : i32, i32
  }
  func.func @transform_4(%arg0: i32) -> (i32, i32) {
    %c0_i32 = arith.constant 0 : i32
    %c0_i32_0 = arith.constant 0 : i32
    %c0_i32_1 = arith.constant 0 : i32
    return %c0_i32, %c0_i32_0 : i32, i32
  }
  func.func @transform_5(%arg0: i32) -> (i32, i32) {
    %c0_i32 = arith.constant 0 : i32
    %c0_i32_0 = arith.constant 0 : i32
    return %arg0, %c0_i32 : i32, i32
  }
}

</mosaic_0001>

<bundles_post_ra>
// kernel: tpu_custom_call.1
= control target key start
LH: loop header
LB: loop body
LE: loop exit
PB: predicated region body
PF: predicated region fallthrough
CT: control target
= control target key end

     0   :  { %10 = vsyncpa [#allocation3], 0  ;;  %s392_s0 = inlined_call_operand.hbm [shape: f32[16,32], index: 0, kind: input, shape index: {}]   ;;  %s393_s1 = inlined_call_operand.vmem [shape: f32[1,32], index: 1, kind: input, shape index: {}]   ;;  %s394_s2 = inlined_call_operand.vmem [shape: f32[1,32], index: 2, kind: input, shape index: {}]   ;;  %s395_s3 = inlined_call_operand.hbm [shape: bf16[32,32], index: 3, kind: input, shape index: {}]   ;;  %s396_s4 = inlined_call_operand.vmem [shape: f32[1,32], index: 4, kind: input, shape index: {}]   ;;  %s397_s5 = inlined_call_operand.hbm [shape: f32[16,32], index: 5, kind: output, shape index: {}]  }
   0x1   :  { %11 = vsyncpa [#allocation6], 0 }
   0x2   :  { %12 = vsyncpa [#allocation4], 0  ;;  %s295_s18 = smov [#allocation2]   ;;  %s223_s22 = scalar_lea.hbm %s392_s0, 256 }
   0x3   :  { %s18_s19 = sshll.u32 %s295_s18, 4  ;;  %p224_p0 = scmp.ne.s32.totalorder %s392_s0, %s223_s22  ;;  %s19_s19 = int_to_ptr.vmem [resolvable:$true] %s18_s19 }
   0x4   :  { %p227_p1 = scmp.lt.u32.totalorder %s223_s22, %s392_s0 }
   0x6   :  { %p229_p2 = pnand %p227_p1, %p224_p0 }
   0x8   :  { %232 = shalt.err (!%p229_p2)
}
   0x9   :  { %s233_s27 = scalar_lea.vmem %s19_s19, 256  ;;  %p238_p4 = scmp.lt.s32.totalorder %s19_s19, %s19_s19 }
   0xa   :  { %p234_p3 = scmp.ne.s32.totalorder %s19_s19, %s233_s27  ;;  %p239_p5 = scmp.lt.s32.totalorder %s233_s27, %s233_s27 }
   0xc   :  { %p240_p6 = por %p239_p5, %p238_p4 }
   0xe   :  { %p241_p7 = pnand %p240_p6, %p234_p3 }
  0x10   :  { %244 = shalt.err (!%p241_p7)
}
  0x11   :  { %s296_s28 = smov 128   ;;  %s297_s29 = smov 8  }
  0x12   :  { %24 = dma.hbm_to_vmem [thread:$0]  %s392_s0, 256, %s19_s19, [#allocation3], %s296_s28, %s296_s28, %s297_s29  }
  0x13   :  { %s298_s7 = smov [#allocation5]   ;;  %s245_s11 = scalar_lea.hbm %s395_s3, 256 }
  0x14   :  { %s34_s8 = sshll.u32 %s298_s7, 4  ;;  %p246_p8 = scmp.ne.s32.totalorder %s395_s3, %s245_s11  ;;  %s35_s8 = int_to_ptr.vmem [resolvable:$true] %s34_s8 }
  0x15   :  { %p249_p9 = scmp.lt.u32.totalorder %s245_s11, %s395_s3 }
  0x17   :  { %p251_p10 = pnand %p249_p9, %p246_p8 }
  0x19   :  { %254 = shalt.err (!%p251_p10)
}
  0x1a   :  { %s255_s16 = scalar_lea.vmem %s35_s8, 256  ;;  %p260_p12 = scmp.lt.s32.totalorder %s35_s8, %s35_s8 }
  0x1b   :  { %p256_p11 = scmp.ne.s32.totalorder %s35_s8, %s255_s16  ;;  %p261_p13 = scmp.lt.s32.totalorder %s255_s16, %s255_s16 }
  0x1d   :  { %p262_p0 = por %p261_p13, %p260_p12 }
  0x1f   :  { %p263_p1 = pnand %p262_p0, %p256_p11 }
  0x21   :  { %266 = shalt.err (!%p263_p1)
}
  0x22   :  { %s299_s0 = smov 64   ;;  %s300_s17 = smov 4  }
  0x23   :  { %40 = dma.hbm_to_vmem [thread:$0]  %s395_s3, 256, %s35_s8, [#allocation6], %s299_s0, %s299_s0, %s300_s17  }
  0x24   :  { %289 = dma.done.wait [#allocation3], 256  }
  0x25   :  { %290 = vsyncadd [#allocation3], 4294967040 }
  0x26   :  { %291 = dma.done.wait [#allocation6], 256  }
  0x27   :  { %292 = vsyncadd [#allocation6], 4294967040  ;;  %vm52_vm0 = vcmask 261120   ;;  %v50_v0 = vld [vmem:[#allocation2] sm:$0xff]  ;;  %v51_v1 = vld [vmem:[#allocation2 + $0x8] sm:$0xff]  ;;  %v301_v9 = vmov 0.0  }
  0x28   :  { %v53_v2 = vsel %vm52_vm0, %v50_v0, 0.0  ;;  %v59_v3 = vmul.f32 %v50_v0, %v50_v0  ;;  %v60_v4 = vmul.f32 %v51_v1, %v51_v1  ;;  %v56_v6 = vsel %vm52_vm0, %v51_v1, 0.0  ;;  %v217_v8 = vld [vmem:[#allocation5] sm:$0xff]   ;;  %200 = vmatprep.subr.bf16.mxu0 %v301_v9  ;;  %v218_v10 = vld [vmem:[#allocation5 + $0x8] sm:$0xff]   ;;  %v191_v28 = vld [vmem:[%s393_s1] ss:$0 sm:$0xff] }
  0x29   :  { %54 = vadd.xlane.f32.xlu0 %v53_v2  ;;  %vm302_vm1 = vmmov 0   ;;  %201 = vmatpush3.bf16.msra.mxu0 %v217_v8  ;;  %v192_v33 = vld [vmem:[%s394_s2] ss:$0 sm:$0xff]  ;;  %s303_s1 = smov [#allocation7]  }
  0x2a   :  { %v61_v5 = vsel %vm52_vm0, %v59_v3, 0.0  ;;  %v64_v7 = vsel %vm52_vm0, %v60_v4, 0.0  ;;  %204 = vmatprep.mubr.msk.bf16.mxu0 %vm302_vm1, %v301_v9  ;;  %202 = vmatprep.subr.bf16.mxu0 %v301_v9  ;;  %v193_v38 = vld [vmem:[%s396_s4] ss:$0 sm:$0xff]  ;;  %s178_s25 = sshll.u32 %s303_s1, 4  ;;  %s179_s25 = int_to_ptr.vmem [resolvable:$true] %s178_s25 }
  0x2b   :  { %62 = vadd.xlane.f32.xlu1 %v61_v5  ;;  %s267_s2 = scalar_lea.vmem %s179_s25, 256  ;;  %p272_p3 = scmp.lt.s32.totalorder %s179_s25, %s179_s25 }
  0x2c   :  { %p268_p2 = scmp.ne.s32.totalorder %s179_s25, %s267_s2  ;;  %p273_p4 = scmp.lt.s32.totalorder %s267_s2, %s267_s2 }
  0x2d   :  { %57 = vadd.xlane.f32.xlu0 %v56_v6  ;;  %203 = vmatpush3.bf16.msra.mxu0 %v218_v10 }
  0x2e   :  { %p274_p5 = por %p273_p4, %p272_p3 }
  0x2f   :  { %65 = vadd.xlane.f32.xlu1 %v64_v7 }
  0x30   :  { %p275_p6 = pnand %p274_p5, %p268_p2 }
  0xb6   :  { %v55_v11 = vpop.xlane.xlu0 %54 }
  0xb7   :  { %v67_v12 = vmul.f32 0.03125, %v55_v11 }
  0xb8   :  { %v63_v13 = vpop.xlane.xlu1 %62 }
  0xb9   :  { %v71_v14 = vmul.f32 %v67_v12, %v67_v12  ;;  %v69_v15 = vmul.f32 0.03125, %v63_v13  ;;  %v79_v25 = vsub.f32 %v50_v0, %v67_v12 }
  0xba   :  { %v58_v16 = vpop.xlane.xlu0 %57 }
  0xbb   :  { %v73_v17 = vsub.f32 %v69_v15, %v71_v14  ;;  %v68_v18 = vmul.f32 0.03125, %v58_v16 }
  0xbc   :  { %v66_v19 = vpop.xlane.xlu1 %65 }
  0xbd   :  { %v75_v20 = vadd.f32 1e-06, %v73_v17  ;;  %v72_v21 = vmul.f32 %v68_v18, %v68_v18  ;;  %v70_v22 = vmul.f32 0.03125, %v66_v19  ;;  %v80_v29 = vsub.f32 %v51_v1, %v68_v18 }
  0xbf   :  { %219 = vrsqrt.f32 %v75_v20  ;;  %v74_v23 = vsub.f32 %v70_v22, %v72_v21 }
  0xc1   :  { %v76_v24 = vadd.f32 1e-06, %v74_v23 }
  0xc3   :  { %221 = vrsqrt.f32 %v76_v24 }
  0xc9   :  { %v220_v26 = vpop.eup %219 }
  0xca   :  { %v81_v27 = vmul.f32 %v220_v26, %v79_v25 }
  0xcc   :  { %v90_v32 = vmul.f32 %v191_v28, %v81_v27 }
  0xcd   :  { %v222_v30 = vpop.eup %221 }
  0xce   :  { %v82_v31 = vmul.f32 %v222_v30, %v80_v29  ;;  %v99_v35 = vadd.f32 %v192_v33, %v90_v32 }
  0xd0   :  { %v91_v34 = vmul.f32 %v191_v28, %v82_v31 }
  0xd2   :  { %v100_v36 = vadd.f32 %v192_v33, %v91_v34 }
  0xd4   :  { %v101_v37 = vpack.c.bf16 %v100_v36, %v99_v35 }
  0xd6   :  { %205 = vmatmul.mubr.msk.bf16.vlgmr.msra.gmra.mrb[0].mxu0 %vm52_vm0, %v101_v37 }
 0x1a9   :  { %v162_v39 = vpop.f32.mrb[0].mxu0 }
 0x1aa   :  { %v163_v40 = vadd.f32 %v193_v38, %v162_v39  ;;  %v206_v41 = vpop.f32.mrb[1].mxu0 }
 0x1ab   :  { %v165_v42 = vpop.f32.mrb[2].mxu0 }
 0x1ac   :  { %v169_v43 = vadd.f32 %v163_v40, %v50_v0  ;;  %v166_v44 = vadd.f32 %v193_v38, %v165_v42  ;;  %v207_v45 = vpop.f32.mrb[3].mxu0 }
 0x1ae   :  { %171 = vst.msk [vmem:[#allocation7] sm:$0xff] %vm52_vm0, %v169_v43  ;;  %v170_v46 = vadd.f32 %v166_v44, %v51_v1 }
 0x1b0   :  { %172 = vst.msk [vmem:[#allocation7 + $0x8] sm:$0xff] %vm52_vm0, %v170_v46 }
 0x1b1   :  { %278 = shalt.err (!%p275_p6)
}
 0x1b2   :  { %s279_s27 = scalar_lea.hbm %s397_s5, 256 }
 0x1b3   :  { %p280_p7 = scmp.ne.s32.totalorder %s397_s5, %s279_s27  ;;  %p283_p8 = scmp.lt.u32.totalorder %s279_s27, %s397_s5 }
 0x1b5   :  { %p285_p9 = pnand %p283_p8, %p280_p7 }
 0x1b7   :  { %288 = shalt.err (!%p285_p9)
}
 0x1b8   :  { %184 = dma.vmem_to_hbm [thread:$0]  %s179_s25, 256, %s397_s5, [#allocation4], %s296_s28, %s296_s28, %s297_s29  }
 0x1b9   :  { %293 = dma.done.wait [#allocation4], 256  }
 0x1ba   :  { %294 = vsyncadd [#allocation4], 4294967040 }
 0x1bb   :  { %188 = vsyncpa [#allocation3], 1 }
 0x1bc   :  { %189 = vsyncpa [#allocation6], 1 }
 0x1bd   :  { %190 = vsyncpa [#allocation4], 1 }

</bundles_post_ra>
